<compile_context>
chip_gen: v7x
topology: tpu7x:2x2x1
jax: 0.10.0
libtpu: 0.0.40
codegen_flags: <defaults>
</compile_context>

<pallas_src>
import jax
import jax.numpy as jnp
from jax.experimental import pallas as pl
from jax.experimental.pallas import tpu as pltpu


def headnet_kernel(x_ref, wbig_ref, wl_ref, bias_ref, value_ref, out_ref):
    # x_ref:     (TB, C*HW)   flattened NCHW activations (lane-dense)
    # wbig_ref:  (C*HW, 2*HW) block-diagonal expanded 1x1-conv weight
    # wl_ref:    (2*HW, A)    linear weight transposed (rows in Flatten order)
    # bias_ref:  (1, A)       linear bias
    # value_ref: (TB, 1)      value-head output (broadcast over actions)
    # out_ref:   (TB, A)      Q values

    # 1x1 conv (no bias) + ReLU on the MXU; result is already in PyTorch
    # Flatten order: [oc0 spatial..., oc1 spatial...].
    z = jnp.dot(x_ref[...], wbig_ref[...], preferred_element_type=jnp.float32)
    z = jnp.maximum(z, 0.0)

    # Advantage Linear: single K = 2*HW MXU dot.
    adv = jnp.dot(z, wl_ref[...], preferred_element_type=jnp.float32)
    adv = adv + bias_ref[...]

    # value + adv - mean(adv): fold (value - mean) into one per-row scalar.
    # NOTE: A (actions) is never tiled, so out_ref.shape[-1] == true A; if an
    # action-tiling grid axis is ever added this mean must be reworked.
    inv_a = 1.0 / out_ref.shape[-1]
    row = value_ref[...] - jnp.sum(adv, axis=-1, keepdims=True) * inv_a
    out_ref[...] = (adv + row).astype(out_ref.dtype)


def _pick_batch_tile(B):
    # Small B: one block covering the whole batch (full-dim blocks are always
    # legal).  Large B: TB=512 keeps the x double-buffer ~1 MiB and gives the
    # grid >= 2 steps (v7x megacore + DMA/compute overlap); non-divisible B is
    # handled by cdiv + masked trailing block, never by a giant single block.
    return B if B <= 512 else 512


def head_net_forward(x_nchw, value, conv_w, lin_w, lin_b):
    """x_nchw: (B, C, H, W); value: (B, 1); conv_w: (2, C, 1, 1);
    lin_w: (A, 2*H*W); lin_b: (A,)."""
    B, C, H, W = x_nchw.shape
    HW = H * W
    A = lin_w.shape[0]
    O = conv_w.shape[0]  # = 2 output channels

    # ---- Host-side layout plumbing (free reshape of x; tiny weight prep) ----
    x_flat = x_nchw.reshape(B, C * HW)            # lane-dense, row-major view

    # Expanded block-diagonal conv weight: w_big[c*HW+s, o*HW+t] = wc[o,c]*[s==t]
    wc = conv_w.reshape(O, C).astype(jnp.float32)
    eye = jnp.eye(HW, dtype=jnp.float32)
    w_big = jnp.einsum("oc,st->csot", wc, eye).reshape(C * HW, O * HW)

    wl_t = lin_w.T.astype(jnp.float32)            # (2*HW, A), Flatten-ordered
    bias = lin_b.reshape(1, A).astype(jnp.float32)

    TB = _pick_batch_tile(B)
    grid = (pl.cdiv(B, TB),)

    cost = pl.CostEstimate(
        flops=2 * B * (C * HW) * (O * HW) + 2 * B * (O * HW) * A,
        transcendentals=0,
        bytes_accessed=4 * (B * C * HW + C * HW * O * HW + O * HW * A
                            + B * A + B + A),
    )

    return pl.pallas_call(
        headnet_kernel,
        out_shape=jax.ShapeDtypeStruct((B, A), jnp.float32),
        grid=grid,
        in_specs=[
            pl.BlockSpec((TB, C * HW), lambda i: (i, 0)),      # x (streamed)
            pl.BlockSpec((C * HW, O * HW), lambda i: (0, 0)),  # expanded conv w
            pl.BlockSpec((O * HW, A), lambda i: (0, 0)),       # lin_w.T
            pl.BlockSpec((1, A), lambda i: (0, 0)),            # bias
            pl.BlockSpec((TB, 1), lambda i: (i, 0)),           # value
        ],
        out_specs=pl.BlockSpec((TB, A), lambda i: (i, 0)),
        compiler_params=pltpu.CompilerParams(
            dimension_semantics=("parallel",)),
        cost_estimate=cost,
    )(x_flat, w_big, wl_t, bias, value)


def head_net_reference(x_nchw, value, conv_w, lin_w, lin_b):
    """Pure-JAX reference mirroring the PyTorch forward."""
    B, C, H, W = x_nchw.shape
    O = conv_w.shape[0]
    # 1x1 conv, no bias: (B, C, H, W) x (O, C) -> (B, O, H, W)
    y = jnp.einsum("bchw,oc->bohw", x_nchw, conv_w.reshape(O, C))
    y = jnp.maximum(y, 0.0)
    flat = y.reshape(B, -1)                        # PyTorch Flatten order
    adv = flat @ lin_w.T + lin_b                   # (B, A)
    return value + adv - adv.mean(axis=-1, keepdims=True)


if __name__ == "__main__":
    # Small shapes consistent with the module: num_filters=4, H=W=8
    # (conv_out = 64), num_actions=16, batch=2.
    B, C, H, W, A = 2, 4, 8, 8, 16
    HW = H * W

    key = jax.random.PRNGKey(0)
    kx, kv, kcw, klw, klb = jax.random.split(key, 5)

    x = jax.random.normal(kx, (B, C, H, W), dtype=jnp.float32)
    value = jax.random.normal(kv, (B, 1), dtype=jnp.float32)

    # Deterministic parameter init (PyTorch-default-like uniform bounds).
    conv_bound = 1.0 / jnp.sqrt(jnp.float32(C))        # fan_in = C*1*1
    conv_w = jax.random.uniform(kcw, (2, C, 1, 1), jnp.float32,
                                minval=-conv_bound, maxval=conv_bound)
    lin_bound = 1.0 / jnp.sqrt(jnp.float32(2 * HW))    # fan_in = 2*conv_out
    lin_w = jax.random.uniform(klw, (A, 2 * HW), jnp.float32,
                               minval=-lin_bound, maxval=lin_bound)
    lin_b = jax.random.uniform(klb, (A,), jnp.float32,
                               minval=-lin_bound, maxval=lin_bound)

    out = head_net_forward(x, value, conv_w, lin_w, lin_b)
    out = jax.block_until_ready(out)

    ref = head_net_reference(x, value, conv_w, lin_w, lin_b)
    assert out.shape == (B, A)
    assert jnp.allclose(out, ref, atol=1e-4, rtol=1e-4), "mismatch vs reference"

    print("KERNEL_OK")
</pallas_src>

<mosaic_0001>
module attributes {stable_mosaic.version = 11 : i64} {
  func.func @headnet_kernel(%arg0: i32, %arg1: memref<2x256xf32, #tpu.memory_space<vmem>>, %arg2: memref<256x128xf32, #tpu.memory_space<vmem>>, %arg3: memref<128x16xf32, #tpu.memory_space<vmem>>, %arg4: memref<1x16xf32, #tpu.memory_space<vmem>>, %arg5: memref<2x1xf32, #tpu.memory_space<vmem>>, %arg6: memref<2x16xf32, #tpu.memory_space<vmem>>) attributes {dimension_semantics = [#tpu.dimension_semantics<parallel>], iteration_bounds = array<i64: 1>, scalar_prefetch = 0 : i64, scratch_operands = 0 : i64, tpu.core_type = #tpu.core_type<tc>, window_params = [{transform_indices = @transform_0, window_bounds = array<i64: 2, 256>}, {pipeline_mode = #tpu.pipeline_mode<synchronous>, transform_indices = @transform_1, window_bounds = array<i64: 256, 128>}, {pipeline_mode = #tpu.pipeline_mode<synchronous>, transform_indices = @transform_2, window_bounds = array<i64: 128, 16>}, {pipeline_mode = #tpu.pipeline_mode<synchronous>, transform_indices = @transform_3, window_bounds = array<i64: 1, 16>}, {transform_indices = @transform_4, window_bounds = array<i64: 2, 1>}, {transform_indices = @transform_5, window_bounds = array<i64: 2, 16>}]} {
    %c0 = arith.constant 0 : index
    %c0_0 = arith.constant 0 : index
    %0 = vector.load %arg1[%c0, %c0_0] : memref<2x256xf32, #tpu.memory_space<vmem>>, vector<2x256xf32>
    %c0_1 = arith.constant 0 : index
    %c0_2 = arith.constant 0 : index
    %1 = vector.load %arg2[%c0_1, %c0_2] : memref<256x128xf32, #tpu.memory_space<vmem>>, vector<256x128xf32>
    %cst = arith.constant dense<0.000000e+00> : vector<2x128xf32>
    %2 = tpu.matmul %0, %1, %cst {dimension_numbers = #tpu.dot_dimension_numbers<[1], [0], [0], [1], [0, 0, 1, 1], [], []>} : vector<2x256xf32>, vector<256x128xf32>, vector<2x128xf32> -> vector<2x128xf32>
    %cst_3 = arith.constant 0.000000e+00 : f32
    %3 = vector.broadcast %cst_3 : f32 to vector<2x128xf32>
    %4 = arith.maximumf %2, %3 : vector<2x128xf32>
    %c0_4 = arith.constant 0 : index
    %c0_5 = arith.constant 0 : index
    %5 = vector.load %arg3[%c0_4, %c0_5] : memref<128x16xf32, #tpu.memory_space<vmem>>, vector<128x16xf32>
    %cst_6 = arith.constant dense<0.000000e+00> : vector<2x16xf32>
    %6 = tpu.matmul %4, %5, %cst_6 {dimension_numbers = #tpu.dot_dimension_numbers<[1], [0], [0], [1], [0, 0, 1, 1], [], []>} : vector<2x128xf32>, vector<128x16xf32>, vector<2x16xf32> -> vector<2x16xf32>
    %c0_7 = arith.constant 0 : index
    %c0_8 = arith.constant 0 : index
    %7 = vector.load %arg4[%c0_7, %c0_8] : memref<1x16xf32, #tpu.memory_space<vmem>>, vector<1x16xf32>
    %8 = vector.broadcast %7 : vector<1x16xf32> to vector<2x16xf32>
    %9 = arith.addf %6, %8 : vector<2x16xf32>
    %c0_9 = arith.constant 0 : index
    %c0_10 = arith.constant 0 : index
    %10 = vector.load %arg5[%c0_9, %c0_10] : memref<2x1xf32, #tpu.memory_space<vmem>>, vector<2x1xf32>
    %cst_11 = arith.constant dense<0.000000e+00> : vector<2xf32>
    %11 = vector.multi_reduction <add>, %9, %cst_11 [1] : vector<2x16xf32> to vector<2xf32>
    %12 = vector.shape_cast %11 : vector<2xf32> to vector<2x1xf32>
    %cst_12 = arith.constant 6.250000e-02 : f32
    %13 = vector.broadcast %cst_12 : f32 to vector<2x1xf32>
    %14 = arith.mulf %12, %13 : vector<2x1xf32>
    %15 = arith.subf %10, %14 : vector<2x1xf32>
    %16 = vector.broadcast %15 : vector<2x1xf32> to vector<2x16xf32>
    %17 = arith.addf %9, %16 : vector<2x16xf32>
    %c0_13 = arith.constant 0 : index
    %c0_14 = arith.constant 0 : index
    %18 = vector.load %arg6[%c0_13, %c0_14] : memref<2x16xf32, #tpu.memory_space<vmem>>, vector<2x16xf32>
    tpu.vector_store %arg6[%c0_13, %c0_14], %17 {strides = array<i32>} : memref<2x16xf32, #tpu.memory_space<vmem>>, vector<2x16xf32>,
    return
  }
  func.func @transform_0(%arg0: i32) -> (i32, i32) {
    %c0_i32 = arith.constant 0 : i32
    %c0_i32_0 = arith.constant 0 : i32
    return %arg0, %c0_i32 : i32, i32
  }
  func.func @transform_1(%arg0: i32) -> (i32, i32) {
    %c0_i32 = arith.constant 0 : i32
    %c0_i32_0 = arith.constant 0 : i32
    %c0_i32_1 = arith.constant 0 : i32
    return %c0_i32, %c0_i32_0 : i32, i32
  }
  func.func @transform_2(%arg0: i32) -> (i32, i32) {
    %c0_i32 = arith.constant 0 : i32
    %c0_i32_0 = arith.constant 0 : i32
    %c0_i32_1 = arith.constant 0 : i32
    return %c0_i32, %c0_i32_0 : i32, i32
  }
  func.func @transform_3(%arg0: i32) -> (i32, i32) {
    %c0_i32 = arith.constant 0 : i32
    %c0_i32_0 = arith.constant 0 : i32
    %c0_i32_1 = arith.constant 0 : i32
    return %c0_i32, %c0_i32_0 : i32, i32
  }
  func.func @transform_4(%arg0: i32) -> (i32, i32) {
    %c0_i32 = arith.constant 0 : i32
    %c0_i32_0 = arith.constant 0 : i32
    return %arg0, %c0_i32 : i32, i32
  }
  func.func @transform_5(%arg0: i32) -> (i32, i32) {
    %c0_i32 = arith.constant 0 : i32
    %c0_i32_0 = arith.constant 0 : i32
    return %arg0, %c0_i32 : i32, i32
  }
}

</mosaic_0001>

<bundles_post_ra>
// kernel: tpu_custom_call.1
= control target key start
LH: loop header
LB: loop body
LE: loop exit
PB: predicated region body
PF: predicated region fallthrough
CT: control target
= control target key end

     0   :  { %10 = vsyncpa [#allocation3], 0  ;;  %s608_s0 = inlined_call_operand.vmem [shape: f32[2,256], index: 0, kind: input, shape index: {}]   ;;  %s609_s1 = inlined_call_operand.hbm [shape: f32[256,128], index: 1, kind: input, shape index: {}]   ;;  %s610_s2 = inlined_call_operand.vmem [shape: f32[128,16], index: 2, kind: input, shape index: {}]   ;;  %s611_s3 = inlined_call_operand.vmem [shape: f32[1,16], index: 3, kind: input, shape index: {}]   ;;  %s612_s4 = inlined_call_operand.vmem [shape: f32[2,1], index: 4, kind: input, shape index: {}]   ;;  %s613_s5 = inlined_call_operand.hbm [shape: f32[2,16], index: 5, kind: output, shape index: {}]  }
   0x1   :  { %11 = vsyncpa [#allocation4], 0  ;;  %s474_s18 = smov [#allocation2]   ;;  %s426_s22 = scalar_lea.hbm %s609_s1, 4096 }
   0x2   :  { %s19_s19 = sshll.u32 %s474_s18, 4  ;;  %p427_p0 = scmp.ne.s32.totalorder %s609_s1, %s426_s22  ;;  %s20_s19 = int_to_ptr.vmem [resolvable:$true] %s19_s19 }
   0x3   :  { %p430_p1 = scmp.lt.u32.totalorder %s426_s22, %s609_s1 }
   0x5   :  { %p432_p2 = pnand %p430_p1, %p427_p0 }
   0x7   :  { %435 = shalt.err (!%p432_p2)
}
   0x8   :  { %s436_s27 = scalar_lea.vmem %s20_s19, 4096  ;;  %p441_p4 = scmp.lt.s32.totalorder %s20_s19, %s20_s19 }
   0x9   :  { %p437_p3 = scmp.ne.s32.totalorder %s20_s19, %s436_s27  ;;  %p442_p5 = scmp.lt.s32.totalorder %s436_s27, %s436_s27 }
   0xb   :  { %p443_p6 = por %p442_p5, %p441_p4 }
   0xd   :  { %p444_p7 = pnand %p443_p6, %p437_p3 }
   0xf   :  { %447 = shalt.err (!%p444_p7)
}
  0x10   :  { %s475_s28 = smov 128   ;;  %s476_s29 = smov 8  }
  0x11   :  { %25 = dma.hbm_to_vmem [thread:$0]  %s609_s1, 4096, %s20_s19, [#allocation3], %s475_s28, %s475_s28, %s476_s29  }
  0x12   :  { %470 = dma.done.wait [#allocation3], 4096  }
  0x13   :  { %471 = vsyncadd [#allocation3], 4294963200  ;;  %v477_v0 = vmov 0.0|0.0   ;;  %v52_v1 = vld [vmem:[#allocation2 + $0x80] sm:$0xff]  ;;  %v53_v2 = vld [vmem:[#allocation2 + $0x88] sm:$0xff]  ;;  %vm478_vm0 = vmmov 0  }
  0x14   :  { %393 = vmatprep.subr.bf16.mxu1 %v477_v0  ;;  %v36_v3 = vld [vmem:[#allocation2] sm:$0xff]  ;;  %v361_v4 = vpack.c.bf16 %v53_v2, %v52_v1  ;;  %v37_v5 = vld [vmem:[#allocation2 + $0x8] sm:$0xff]  ;;  %v54_v6 = vld [vmem:[#allocation2 + $0x90] sm:$0xff]  ;;  %vm244_vm1 = vcmask 123904   ;;  %s481_s15 = smov [#allocation5]  }
  0x15   :  { %v55_v7 = vld [vmem:[#allocation2 + $0x98] sm:$0xff]  ;;  %v363_v8 = vpack.c.bf16 %v37_v5, %v36_v3  ;;  %v38_v10 = vld [vmem:[#allocation2 + $0x10] sm:$0xff]  ;;  %v56_v12 = vld [vmem:[#allocation2 + $0xa0] sm:$0xff]  ;;  %s263_s16 = sshll.u32 %s481_s15, 4  ;;  %s264_s16 = int_to_ptr.vmem [resolvable:$true] %s263_s16 }
  0x16   :  { %v365_v9 = vpack.c.bf16 %v55_v7, %v54_v6  ;;  %v39_v11 = vld [vmem:[#allocation2 + $0x18] sm:$0xff]  ;;  %362 = vmatprep.subr.bf16.mxu0 %v361_v4  ;;  %v57_v13 = vld [vmem:[#allocation2 + $0xa8] sm:$0xff]  ;;  %v40_v16 = vld [vmem:[#allocation2 + $0x20] sm:$0xff]  ;;  %p453_p9 = scmp.lt.s32.totalorder %s264_s16, %s264_s16 }
  0x17   :  { %364 = vmatpush3.bf16.msra.mxu0 %v363_v8  ;;  %v367_v14 = vpack.c.bf16 %v39_v11, %v38_v10  ;;  %v369_v15 = vpack.c.bf16 %v57_v13, %v56_v12  ;;  %v41_v17 = vld [vmem:[#allocation2 + $0x28] sm:$0xff]  ;;  %v58_v18 = vld [vmem:[#allocation2 + $0xb0] sm:$0xff]  ;;  %v59_v19 = vld [vmem:[#allocation2 + $0xb8] sm:$0xff]  ;;  %v479_v12 = vmov 0.0  }
  0x18   :  { %366 = vmatprep.subr.bf16.mxu0 %v365_v9  ;;  %v371_v20 = vpack.c.bf16 %v41_v17, %v40_v16  ;;  %v373_v21 = vpack.c.bf16 %v59_v19, %v58_v18  ;;  %v42_v22 = vld [vmem:[#allocation2 + $0x30] sm:$0xff]  ;;  %v43_v23 = vld [vmem:[#allocation2 + $0x38] sm:$0xff]  ;;  %v60_v24 = vld [vmem:[#allocation2 + $0xc0] sm:$0xff]  ;;  %358 = vmatprep.mubr.msk.f32.mxu1 %vm478_vm0, %v479_v12 }
  0x19   :  { %v61_v25 = vld [vmem:[#allocation2 + $0xc8] sm:$0xff]  ;;  %v528_v26 = vld.sshfl [vmem:[%s608_s0] sm:$0x33 pattern:$0x76325410]  ;;  %v152_v30 = vld [vmem:[%s610_s2 + $0x10] sm:$0xff]  ;;  %v375_v31 = vpack.c.bf16 %v43_v23, %v42_v22 }
  0x1a   :  { %v76_v27 = vcombine.high %v528_v26, %v528_v26  ;;  %v150_v28 = vld [vmem:[%s610_s2] sm:$0xff]  ;;  %v151_v29 = vld [vmem:[%s610_s2 + $0x8] sm:$0xff]  ;;  %v153_v33 = vld [vmem:[%s610_s2 + $0x18] sm:$0xff]  ;;  %v377_v34 = vpack.c.bf16 %v61_v25, %v60_v24 }
  0x1b   :  { %368 = vmatpush3.bf16.msra.mxu0 %v367_v14  ;;  %v394_v32 = vpack.c.bf16 %v151_v29, %v150_v28  ;;  %v44_v35 = vld [vmem:[#allocation2 + $0x40] sm:$0xff]  ;;  %v45_v36 = vld [vmem:[#allocation2 + $0x48] sm:$0xff]  ;;  %v62_v37 = vld [vmem:[#allocation2 + $0xd0] sm:$0xff]  ;;  %v397_v39 = vpack.c.bf16 %v153_v33, %v152_v30 }
  0x1c   :  { %370 = vmatprep.subr.bf16.mxu0 %v369_v15  ;;  %143 = vmatprep.mubr.f32.mxu0 %v76_v27  ;;  %v63_v38 = vld [vmem:[#allocation2 + $0xd8] sm:$0xff]  ;;  %v154_v40 = vld [vmem:[%s610_s2 + $0x20] sm:$0xff]  ;;  %v155_v41 = vld [vmem:[%s610_s2 + $0x28] sm:$0xff]  ;;  %v379_v42 = vpack.c.bf16 %v45_v36, %v44_v35 }
  0x1d   :  { %395 = vmatpush3.bf16.msra.mxu1 %v394_v32  ;;  %v381_v43 = vpack.c.bf16 %v63_v38, %v62_v37  ;;  %v46_v44 = vld [vmem:[#allocation2 + $0x50] sm:$0xff]  ;;  %v47_v45 = vld [vmem:[#allocation2 + $0x58] sm:$0xff]  ;;  %v64_v46 = vld [vmem:[#allocation2 + $0xe0] sm:$0xff]  ;;  %v400_v48 = vpack.c.bf16 %v155_v41, %v154_v40 }
  0x1e   :  { %396 = vmatprep.subr.bf16.mxu1 %v477_v0  ;;  %v65_v47 = vld [vmem:[#allocation2 + $0xe8] sm:$0xff]  ;;  %v156_v49 = vld [vmem:[%s610_s2 + $0x30] sm:$0xff]  ;;  %v157_v50 = vld [vmem:[%s610_s2 + $0x38] sm:$0xff]  ;;  %v383_v51 = vpack.c.bf16 %v47_v45, %v46_v44 }
  0x1f   :  { %372 = vmatpush3.bf16.msra.mxu0 %v371_v20  ;;  %v385_v52 = vpack.c.bf16 %v65_v47, %v64_v46  ;;  %v48_v53 = vld [vmem:[#allocation2 + $0x60] sm:$0xff]  ;;  %v49_v54 = vld [vmem:[#allocation2 + $0x68] sm:$0xff]  ;;  %v66_v55 = vld [vmem:[#allocation2 + $0xf0] sm:$0xff]  ;;  %v403_v57 = vpack.c.bf16 %v157_v50, %v156_v49 }
  0x20   :  { %374 = vmatprep.subr.bf16.mxu0 %v373_v21  ;;  %v67_v56 = vld [vmem:[#allocation2 + $0xf8] sm:$0xff]  ;;  %v158_v58 = vld [vmem:[%s610_s2 + $0x40] sm:$0xff]  ;;  %v159_v59 = vld [vmem:[%s610_s2 + $0x48] sm:$0xff]  ;;  %v387_v60 = vpack.c.bf16 %v49_v54, %v48_v53  ;;  %v480_v21 = vmov 0  }
  0x21   :  { %398 = vmatpush3.bf16.msra.mxu1 %v397_v39  ;;  %v389_v61 = vpack.c.bf16 %v67_v56, %v66_v55  ;;  %v50_v62 = vld [vmem:[#allocation2 + $0x70] sm:$0xff]  ;;  %v51_v63 = vld [vmem:[#allocation2 + $0x78] sm:$0xff]  ;;  %v406_v1 = vpack.c.bf16 %v159_v59, %v158_v58  ;;  %v162_v6 = vld [vmem:[%s610_s2 + $0x60] sm:$0xff]  ;;  %425 = vset.pattern.permute.xlu0 %v480_v21 }
  0x22   :  { %399 = vmatprep.subr.bf16.mxu1 %v477_v0  ;;  %v160_v2 = vld [vmem:[%s610_s2 + $0x50] sm:$0xff]  ;;  %v161_v3 = vld [vmem:[%s610_s2 + $0x58] sm:$0xff]  ;;  %v391_v4 = vpack.c.bf16 %v51_v63, %v50_v62  ;;  %v163_v7 = vld [vmem:[%s610_s2 + $0x68] sm:$0xff] }
  0x23   :  { %376 = vmatpush3.bf16.msra.mxu0 %v375_v31  ;;  %v409_v5 = vpack.c.bf16 %v161_v3, %v160_v2  ;;  %v412_v8 = vpack.c.bf16 %v163_v7, %v162_v6  ;;  %v164_v9 = vld [vmem:[%s610_s2 + $0x70] sm:$0xff]  ;;  %v165_v10 = vld [vmem:[%s610_s2 + $0x78] sm:$0xff]  ;;  %v243_v22 = vld [vmem:[%s612_s4] sm:$0x3] }
  0x24   :  { %378 = vmatprep.subr.bf16.mxu0 %v377_v34  ;;  %v415_v11 = vpack.c.bf16 %v165_v10, %v164_v9 }
  0x25   :  { %401 = vmatpush3.bf16.msra.mxu1 %v400_v48 }
  0x26   :  { %402 = vmatprep.subr.bf16.mxu1 %v477_v0 }
  0x27   :  { %380 = vmatpush3.bf16.msra.mxu0 %v379_v42 }
  0x28   :  { %382 = vmatprep.subr.bf16.mxu0 %v381_v43 }
  0x29   :  { %404 = vmatpush3.bf16.msra.mxu1 %v403_v57 }
  0x2a   :  { %405 = vmatprep.subr.bf16.mxu1 %v477_v0 }
  0x2b   :  { %384 = vmatpush3.bf16.msra.mxu0 %v383_v51 }
  0x2c   :  { %386 = vmatprep.subr.bf16.mxu0 %v385_v52 }
  0x2d   :  { %407 = vmatpush3.bf16.msra.mxu1 %v406_v1 }
  0x2e   :  { %408 = vmatprep.subr.bf16.mxu1 %v477_v0 }
  0x2f   :  { %388 = vmatpush3.bf16.msra.mxu0 %v387_v60 }
  0x30   :  { %390 = vmatprep.subr.bf16.mxu0 %v389_v61 }
  0x31   :  { %410 = vmatpush3.bf16.msra.mxu1 %v409_v5 }
  0x32   :  { %411 = vmatprep.subr.bf16.mxu1 %v477_v0 }
  0x33   :  { %392 = vmatpush3.bf16.msra.mxu0 %v391_v4 }
  0x35   :  { %413 = vmatpush3.bf16.msra.mxu1 %v412_v8 }
  0x36   :  { %144 = vmatmul.mubr.f32.vlgmr.msra.gmra.mrb[0].mxu0 %v528_v26  ;;  %414 = vmatprep.subr.bf16.mxu1 %v477_v0  ;;  %v273_v0 = vld [vmem:[%s611_s3] ss:$0 sm:$0xff]  ;;  %s448_s3 = scalar_lea.vmem %s264_s16, 32 }
  0x37   :  { %p449_p8 = scmp.ne.s32.totalorder %s264_s16, %s448_s3  ;;  %p454_p10 = scmp.lt.s32.totalorder %s448_s3, %s448_s3 }
  0x39   :  { %416 = vmatpush3.bf16.msra.mxu1 %v415_v11  ;;  %p455_p11 = por %p454_p10, %p453_p9 }
  0x3b   :  { %p456_p12 = pnand %p455_p11, %p449_p8 }
 0x109   :  { %v306_v13 = vpop.f32.mrb[0].mxu0 }
 0x10a   :  { %v307_v14 = vpop.f32.mrb[1].mxu0 }
 0x10b   :  { %v308_v15 = vadd.f32 %v307_v14, %v306_v13 }
 0x10d   :  { %v149_v16 = vmax.f32 %v308_v15, 0.0 }
 0x10f   :  { %359 = vmatmul.mubr.f32.vlgmr.msra.gmra.mrb[0].mxu1 %v149_v16 }
 0x1e2   :  { %v239_v17 = vpop.f32.mrb[0].mxu1 }
 0x1e3   :  { %v240_v18 = vadd.f32 %v273_v0, %v239_v17  ;;  %v360_v19 = vpop.f32.mrb[1].mxu1 }
 0x1e5   :  { %v245_v20 = vsel %vm244_vm1, %v240_v18, 0.0 }
 0x1e6   :  { %246 = vadd.xlane.f32.xlu0 %v245_v20 }
 0x273   :  { %v247_v23 = vpop.xlane.xlu0 %246 }
 0x274   :  { %v248_v24 = vmul.f32 0.0625, %v247_v23 }
 0x276   :  { %v249_v25 = vsub.f32 %v243_v22, %v248_v24 }
 0x278   :  { %252 = vperm.xlu0 %425, %v249_v25  }
 0x2f7   :  { %v253_v26 = vpop.permute.xlu0 %252 }
 0x2f8   :  { %v255_v27 = vadd.f32 %v253_v26, %v240_v18 }
 0x2fa   :  { %256 = vst.msk [vmem:[#allocation5] sm:$0x3] %vm244_vm1, %v255_v27 }
 0x2fb   :  { %459 = shalt.err (!%p456_p12)
}
 0x2fc   :  { %s460_s18 = scalar_lea.hbm %s613_s5, 32 }
 0x2fd   :  { %p461_p13 = scmp.ne.s32.totalorder %s613_s5, %s460_s18  ;;  %p464_p0 = scmp.lt.u32.totalorder %s460_s18, %s613_s5 }
 0x2ff   :  { %p466_p1 = pnand %p464_p0, %p461_p13 }
 0x301   :  { %469 = shalt.err (!%p466_p1)
}
 0x302   :  { %266 = dma.vmem_to_hbm [thread:$0]  %s264_s16, 32, %s613_s5, [#allocation4]  }
 0x303   :  { %472 = dma.done.wait [#allocation4], 32  }
 0x304   :  { %473 = vsyncadd [#allocation4], 4294967264 }
 0x305   :  { %270 = vsyncpa [#allocation3], 1 }
 0x306   :  { %271 = vsyncpa [#allocation4], 1 }

</bundles_post_ra>
